<compile_context>
chip_gen: v5e
topology: v5e:2x2
jax: 0.10.0
libtpu: 0.0.40
codegen_flags: <defaults>
</compile_context>

<pallas_src>
import jax
import jax.numpy as jnp
from jax.experimental import pallas as pl
from jax.experimental.pallas import tpu as pltpu

LANES = 128  # pad the batch/lane axis to a multiple of this


def mlp_kernel(x_ref, p_ref, o_ref):
    # x_ref : (1, NP)  batch on lanes, NP a multiple of 128
    # p_ref : (H, 4)   packed params: [w1 | b1 | w2 | b2-bcast] per column
    # o_ref : (1, NP)  lane-dense output
    w1 = p_ref[:, 0:1]       # (H, 1)
    b1 = p_ref[:, 1:2]       # (H, 1)
    w2 = p_ref[:, 2:3]       # (H, 1)
    b2 = p_ref[0:1, 3:4]     # (1, 1)

    # Hidden layer: outer-product + bias + ReLU, fused VPU chain.
    h = jnp.maximum(w1 * x_ref[...] + b1, 0.0)            # (H, NP)
    # Output layer: weight over hidden units, reduce over H (sublane axis, XLU).
    y = jnp.sum(w2 * h, axis=0, keepdims=True) + b2       # (1, NP)
    o_ref[...] = y.astype(o_ref.dtype)


def pack_params(w1, b1, w2, b2):
    """Pack (w1:(1,H), b1:(1,H), w2:(H,1), b2:(1,1)) into one (H, 4) array.

    Done ONCE at init / after each optimizer step — not on the per-forward path.
    """
    h = w1.shape[1]
    return jnp.concatenate(
        [
            w1.reshape(h, 1),
            b1.reshape(h, 1),
            w2.reshape(h, 1),
            jnp.broadcast_to(b2.reshape(1, 1), (h, 1)),
        ],
        axis=1,
    )  # (H, 4)


@jax.jit
def net_forward(x, params):
    """x: (N, 1) float32, params: (H, 4) packed  ->  (N, 1) float32."""
    n, f = x.shape
    h = params.shape[0]
    assert f == 1, "kernel is specialized for n_feature=1, n_output=1"

    n_pad = ((n + LANES - 1) // LANES) * LANES

    # Layout plumbing fuses inside this jit: relayout + pad + slice are not
    # standalone dispatches.
    x_t = x.reshape(1, n)
    if n_pad != n:
        x_t = jnp.pad(x_t, ((0, 0), (0, n_pad - n)))       # (1, NP)

    vmem = pl.BlockSpec(memory_space=pltpu.MemorySpace.VMEM)

    y_t = pl.pallas_call(
        mlp_kernel,
        out_shape=jax.ShapeDtypeStruct((1, n_pad), x.dtype),
        in_specs=[vmem, vmem],
        out_specs=vmem,
        cost_estimate=pl.CostEstimate(
            flops=4 * n_pad * h,                   # 2 mul-adds per (n, h) pair
            transcendentals=0,
            bytes_accessed=(2 * n_pad + 4 * h) * 4,
        ),
    )(x_t, params)

    return y_t[:, :n].reshape(n, 1)


def init_params(key, n_feature, n_hidden, n_output):
    """Deterministic init mimicking torch.nn.Linear (uniform +-1/sqrt(fan_in))."""
    k1, k2, k3, k4 = jax.random.split(key, 4)
    lim1 = 1.0 / jnp.sqrt(jnp.float32(n_feature))
    lim2 = 1.0 / jnp.sqrt(jnp.float32(n_hidden))
    w1 = jax.random.uniform(k1, (n_feature, n_hidden), jnp.float32, -lim1, lim1)
    b1 = jax.random.uniform(k2, (1, n_hidden), jnp.float32, -lim1, lim1)
    w2 = jax.random.uniform(k3, (n_hidden, n_output), jnp.float32, -lim2, lim2)
    b2 = jax.random.uniform(k4, (1, n_output), jnp.float32, -lim2, lim2)
    return w1, b1, w2, b2


if __name__ == "__main__":
    # Shapes implied by the reference script: x = linspace(-1, 1, 100)[:, None]
    n_feature, n_hidden, n_output = 1, 10, 1
    batch = 100

    key = jax.random.PRNGKey(0)
    w1, b1, w2, b2 = init_params(key, n_feature, n_hidden, n_output)
    params = pack_params(w1, b1, w2, b2)   # packed once, outside the hot path

    x = jnp.linspace(-1.0, 1.0, batch, dtype=jnp.float32).reshape(batch, 1)

    out = net_forward(x, params)
    out = jax.block_until_ready(out)

    # Cross-check against a plain-JAX reference of the same forward pass.
    ref = jnp.maximum(x @ w1 + b1, 0.0) @ w2 + b2
    assert out.shape == (batch, n_output)
    assert jnp.allclose(out, ref, atol=1e-5, rtol=1e-5)

    print("KERNEL_OK")
</pallas_src>

<mosaic_0001>
module attributes {stable_mosaic.version = 11 : i64} {
  func.func @mlp_kernel(%arg0: memref<1x128xf32, #tpu.memory_space<vmem>>, %arg1: memref<10x4xf32, #tpu.memory_space<vmem>>, %arg2: memref<1x128xf32, #tpu.memory_space<vmem>>) attributes {dimension_semantics = [], scalar_prefetch = 0 : i64, scratch_operands = 0 : i64, tpu.core_type = #tpu.core_type<tc>} {
    %c0 = arith.constant 0 : index
    %c0_0 = arith.constant 0 : index
    %0 = vector.load %arg1[%c0, %c0_0] : memref<10x4xf32, #tpu.memory_space<vmem>>, vector<10x1xf32>
    %c0_1 = arith.constant 0 : index
    %c1 = arith.constant 1 : index
    %1 = vector.load %arg1[%c0_1, %c1] : memref<10x4xf32, #tpu.memory_space<vmem>>, vector<10x1xf32>
    %c0_2 = arith.constant 0 : index
    %c2 = arith.constant 2 : index
    %2 = vector.load %arg1[%c0_2, %c2] : memref<10x4xf32, #tpu.memory_space<vmem>>, vector<10x1xf32>
    %c0_3 = arith.constant 0 : index
    %c3 = arith.constant 3 : index
    %3 = vector.load %arg1[%c0_3, %c3] : memref<10x4xf32, #tpu.memory_space<vmem>>, vector<1x1xf32>
    %c0_4 = arith.constant 0 : index
    %c0_5 = arith.constant 0 : index
    %4 = vector.load %arg0[%c0_4, %c0_5] : memref<1x128xf32, #tpu.memory_space<vmem>>, vector<1x128xf32>
    %5 = vector.broadcast %0 : vector<10x1xf32> to vector<10x128xf32>
    %6 = vector.broadcast %4 : vector<1x128xf32> to vector<10x128xf32>
    %7 = arith.mulf %5, %6 : vector<10x128xf32>
    %8 = vector.broadcast %1 : vector<10x1xf32> to vector<10x128xf32>
    %9 = arith.addf %7, %8 : vector<10x128xf32>
    %cst = arith.constant 0.000000e+00 : f32
    %10 = vector.broadcast %cst : f32 to vector<10x128xf32>
    %11 = arith.maximumf %9, %10 : vector<10x128xf32>
    %12 = vector.broadcast %2 : vector<10x1xf32> to vector<10x128xf32>
    %13 = arith.mulf %12, %11 : vector<10x128xf32>
    %cst_6 = arith.constant dense<0.000000e+00> : vector<128xf32>
    %14 = vector.multi_reduction <add>, %13, %cst_6 [0] : vector<10x128xf32> to vector<128xf32>
    %15 = vector.shape_cast %14 : vector<128xf32> to vector<1x128xf32>
    %16 = vector.broadcast %3 : vector<1x1xf32> to vector<1x128xf32>
    %17 = arith.addf %15, %16 : vector<1x128xf32>
    %c0_7 = arith.constant 0 : index
    %c0_8 = arith.constant 0 : index
    %18 = vector.load %arg2[%c0_7, %c0_8] : memref<1x128xf32, #tpu.memory_space<vmem>>, vector<1x128xf32>
    tpu.vector_store %arg2[%c0_7, %c0_8], %17 {strides = array<i32>} : memref<1x128xf32, #tpu.memory_space<vmem>>, vector<1x128xf32>,
    return
  }
}

</mosaic_0001>

<bundles_post_ra>
// kernel: net_forward.1
= control target key start
LH: loop header
LB: loop body
LE: loop exit
PB: predicated region body
PF: predicated region fallthrough
CT: control target
= control target key end

     0   :  { %v81_v0 = vmov 1   ;;  %v82_v1 = vmov 0   ;;  %v83_v3 = vmov 2   ;;  %v84_v6 = vmov 3   ;;  %s115_s1 = inlined_call_operand.vmem [shape: f32[10,4], index: 1, kind: input, shape index: {}]   ;;  %s116_s0 = inlined_call_operand.vmem [shape: f32[1,128], index: 0, kind: input, shape index: {}]   ;;  %s117_s2 = inlined_call_operand.vmem [shape: f32[1,128], index: 2, kind: output, shape index: {}]  }
   0x1   :  { %77 = vset.pattern.permute.xlu1 %v81_v0  ;;  %76 = vset.pattern.permute.xlu0 %v82_v1  ;;  %v12_v2 = vld [vmem:[%s115_s1 + $0x8] sm:$0x3]  ;;  %v11_v4 = vld [vmem:[%s115_s1] sm:$0xff]  ;;  %vm52_vm0 = vcmask 1041408  }
   0x2   :  { %35 = vperm.xlu1 %77, %v12_v2   ;;  %22 = vperm.xlu0 %76, %v12_v2   ;;  %v13_v5 = vld [vmem:[%s115_s1] sm:$0x1] }
   0x3   :  { %78 = vset.pattern.permute.xlu2 %v83_v3  ;;  %v80_v7 = vld [vmem:[%s116_s0] ss:$0 sm:$0xff] }
   0x4   :  { %47 = vperm.xlu2 %78, %v12_v2  }
   0xa   :  { %31 = vperm.xlu1 %77, %v11_v4   ;;  %17 = vperm.xlu0 %76, %v11_v4  }
   0xc   :  { %43 = vperm.xlu2 %78, %v11_v4  }
  0x12   :  { %79 = vset.pattern.permute.xlu0 %v84_v6 }
  0x13   :  { %63 = vperm.xlu0 %79, %v13_v5  }
  0x5e   :  { %v48_v11 = vpop.permute.xlu2 %47 }
  0x66   :  { %v44_v20 = vpop.permute.xlu2 %43 }
  0x74   :  { %v36_v8 = vpop.permute.xlu1 %35  ;;  %v23_v9 = vpop.permute.xlu0 %22 }
  0x75   :  { %v29_v10 = vmul.f32 %v80_v7, %v23_v9 }
  0x77   :  { %v39_v12 = vadd.f32 %v36_v8, %v29_v10 }
  0x79   :  { %v41_v13 = vmax.f32 %v39_v12, 0.0 }
  0x7b   :  { %v51_v18 = vmul.f32 %v48_v11, %v41_v13 }
  0x7c   :  { %v18_v14 = vpop.permute.xlu0 %17  ;;  %v32_v16 = vpop.permute.xlu1 %31 }
  0x7d   :  { %v28_v15 = vmul.f32 %v80_v7, %v18_v14  ;;  %v53_v22 = vsel %vm52_vm0, %v51_v18, 0.0 }
  0x7f   :  { %v38_v17 = vadd.f32 %v32_v16, %v28_v15 }
  0x81   :  { %v40_v19 = vmax.f32 %v38_v17, 0.0 }
  0x83   :  { %v50_v21 = vmul.f32 %v44_v20, %v40_v19 }
  0x85   :  { %v54_v23 = vadd.f32 %v53_v22, %v50_v21  ;;  %v64_v29 = vpop.permute.xlu0 %63 }
  0x87   :  { %v55_v24 = vrot.slane %v54_v23, 4 }
  0x89   :  { %v56_v25 = vadd.f32 %v55_v24, %v54_v23 }
  0x8b   :  { %v57_v26 = vrot.slane %v56_v25, 2 }
  0x8d   :  { %v58_v27 = vadd.f32 %v57_v26, %v56_v25 }
  0x8f   :  { %v59_v28 = vrot.slane %v58_v27, 1 }
  0x91   :  { %v60_v30 = vadd.f32 %v59_v28, %v58_v27 }
  0x93   :  { %v66_v31 = vadd.f32 %v64_v29, %v60_v30 }
  0x95   :  { %67 = vst [vmem:[%s117_s2] sm:$0x1] %v66_v31 }

</bundles_post_ra>
